<compile_context>
chip_gen: v6e
topology: v6e:2x2x1
jax: 0.10.0
libtpu: 0.0.40
codegen_flags: <defaults>
</compile_context>

<pallas_src>
import functools

import jax
import jax.numpy as jnp
from jax.experimental import pallas as pl
from jax.experimental.pallas import tpu as pltpu


def _round_up(x, m):
    return ((x + m - 1) // m) * m


def _lbnneck_kernel(x_ref, gamma_ref, beta_ref, w_ref, cl_ref, trip_ref, bn_ref):
    # ---- normalize + BatchNorm: computed once, reused for every weight tile ----
    @pl.when(pl.program_id(0) == 0)
    def _():
        x = x_ref[...].astype(jnp.float32)                    # (B, D)

        # F.normalize(x, p=2, dim=1, eps=1e-12)
        sq = jnp.sum(x * x, axis=1, keepdims=True)            # (B, 1)
        norm = jnp.maximum(jnp.sqrt(sq), 1e-12)
        inv = pl.reciprocal(norm, approx=False)               # B EUP ops, not B*D
        t = x * inv                                           # triplet_feat
        trip_ref[...] = t.astype(trip_ref.dtype)

        # BatchNorm1d, training mode (batch stats, biased variance, eps=1e-5)
        mean = jnp.mean(t, axis=0, keepdims=True)             # (1, D)
        d = t - mean
        var = jnp.mean(d * d, axis=0, keepdims=True)
        scale = gamma_ref[...] * jax.lax.rsqrt(var + 1e-5)    # fold gamma in once
        bn = d * scale + beta_ref[...]                        # test_feat
        bn_ref[...] = bn.astype(bn_ref.dtype)                 # cast once for MXU

    # ---- fc tile: (B, D) @ (D, tn) on the MXU, f32 accumulate ----
    cl_ref[...] = jnp.dot(
        bn_ref[...], w_ref[...], preferred_element_type=jnp.float32
    ).astype(cl_ref.dtype)


@functools.partial(jax.jit, static_argnames=("tn", "matmul_dtype"))
def lbnneck_forward(x, w_t, gamma, beta, *, tn=256, matmul_dtype=jnp.bfloat16):
    """x: (B, C, H, W) or (B, D); w_t: (D, num_classes); gamma/beta: (D,) or (1, D).

    Returns (cl_feat (B, num_classes) f32, triplet_feat (B, D) f32).
    """
    B = x.shape[0]
    x2d = x.reshape(B, -1)                                    # glue: flatten
    D = x2d.shape[1]
    C = w_t.shape[1]

    # Pad num_classes to a lane-dense, tileable width (multiple of 128).
    c_pad = _round_up(C, 128)
    tn = min(tn, c_pad)
    c_pad = _round_up(c_pad, tn)
    n_tiles = c_pad // tn

    w_p = jnp.pad(w_t.astype(matmul_dtype), ((0, 0), (0, c_pad - C)))
    gamma2 = gamma.reshape(1, D).astype(jnp.float32)
    beta2 = beta.reshape(1, D).astype(jnp.float32)

    itemsize = jnp.dtype(matmul_dtype).itemsize
    cost = pl.CostEstimate(
        flops=2 * B * D * c_pad,
        transcendentals=2 * B + D,                            # recip per row, rsqrt per feature
        bytes_accessed=(B * D * 4                              # x
                        + D * c_pad * itemsize                 # weight stream
                        + 2 * D * 4                            # gamma, beta
                        + B * c_pad * 4 + B * D * 4),          # outputs
    )

    cl_pad, trip = pl.pallas_call(
        _lbnneck_kernel,
        out_shape=(
            jax.ShapeDtypeStruct((B, c_pad), jnp.float32),     # cl_feat (padded)
            jax.ShapeDtypeStruct((B, D), jnp.float32),         # triplet_feat
        ),
        grid_spec=pltpu.PrefetchScalarGridSpec(
            num_scalar_prefetch=0,
            grid=(n_tiles,),
            in_specs=[
                pl.BlockSpec((B, D), lambda j: (0, 0)),        # x: resident
                pl.BlockSpec((1, D), lambda j: (0, 0)),        # gamma: resident
                pl.BlockSpec((1, D), lambda j: (0, 0)),        # beta: resident
                pl.BlockSpec((D, tn), lambda j: (0, j)),       # weight: streamed per tile
            ],
            out_specs=(
                pl.BlockSpec((B, tn), lambda j: (0, j)),       # cl tile
                pl.BlockSpec((B, D), lambda j: (0, 0)),        # triplet: resident
            ),
            scratch_shapes=[pltpu.VMEM((B, D), matmul_dtype)],  # bn, reused each tile
        ),
        compiler_params=pltpu.CompilerParams(
            # "arbitrary": grid step 0 initializes the bn scratch / triplet output.
            dimension_semantics=("arbitrary",),
            vmem_limit_bytes=32 * 1024 * 1024,
        ),
        cost_estimate=cost,
    )(x2d, gamma2, beta2, w_p)

    return cl_pad[:, :C], trip


def _reference(x, w_t, gamma, beta):
    B = x.shape[0]
    x2d = x.reshape(B, -1).astype(jnp.float32)
    norm = jnp.maximum(jnp.linalg.norm(x2d, axis=1, keepdims=True), 1e-12)
    t = x2d / norm
    mean = jnp.mean(t, axis=0, keepdims=True)
    var = jnp.mean((t - mean) ** 2, axis=0, keepdims=True)
    bn = (t - mean) / jnp.sqrt(var + 1e-5) * gamma.reshape(1, -1) + beta.reshape(1, -1)
    return bn @ w_t, t


if __name__ == "__main__":
    key = jax.random.PRNGKey(0)
    k_x, k_w = jax.random.split(key)

    # Small shapes: B multiple of 8 (full sublanes), D = C*H*W = 128 (full lane),
    # num_classes not a multiple of 128 to exercise the padding + N-tiling path.
    B, Cch, H, W = 8, 4, 4, 8
    in_planes = Cch * H * W          # 128
    num_classes = 300                # padded to 512 -> 2 weight tiles of 256

    x = jax.random.normal(k_x, (B, Cch, H, W), dtype=jnp.float32)

    # Deterministic parameter init (mirrors the module's __init__ rules):
    #   fc.weight ~ N(0, 0.001), bias=False  -> stored transposed (D, num_classes)
    #   BN.weight = 1, BN.bias = 0 (bias frozen)
    w_t = 0.001 * jax.random.normal(k_w, (in_planes, num_classes), dtype=jnp.float32)
    gamma = jnp.ones((1, in_planes), dtype=jnp.float32)
    beta = jnp.zeros((1, in_planes), dtype=jnp.float32)

    cl_feat, triplet_feat = lbnneck_forward(x, w_t, gamma, beta)
    jax.block_until_ready((cl_feat, triplet_feat))

    ref_cl, ref_trip = _reference(x, w_t, gamma, beta)
    assert cl_feat.shape == (B, num_classes)
    assert triplet_feat.shape == (B, in_planes)
    # triplet path is pure f32 -> tight tolerance.
    assert jnp.allclose(triplet_feat, ref_trip, atol=1e-6, rtol=1e-5)
    # classifier path streams the weight / activations in bf16 -> looser tolerance.
    assert jnp.allclose(cl_feat, ref_cl, atol=1e-3, rtol=2e-2)

    print("KERNEL_OK")
</pallas_src>

<mosaic_0001>
module attributes {stable_mosaic.version = 11 : i64} {
  func.func @_lbnneck_kernel(%arg0: i32, %arg1: memref<8x128xf32, #tpu.memory_space<vmem>>, %arg2: memref<1x128xf32, #tpu.memory_space<vmem>>, %arg3: memref<1x128xf32, #tpu.memory_space<vmem>>, %arg4: memref<128x256xbf16, #tpu.memory_space<vmem>>, %arg5: memref<8x256xf32, #tpu.memory_space<vmem>>, %arg6: memref<8x128xf32, #tpu.memory_space<vmem>>, %arg7: memref<8x128xbf16, #tpu.memory_space<vmem>>) attributes {dimension_semantics = [#tpu.dimension_semantics<arbitrary>], iteration_bounds = array<i64: 2>, scalar_prefetch = 0 : i64, scratch_operands = 1 : i64, tpu.core_type = #tpu.core_type<tc>, window_params = [{pipeline_mode = #tpu.pipeline_mode<synchronous>, transform_indices = @transform_0, window_bounds = array<i64: 8, 128>}, {pipeline_mode = #tpu.pipeline_mode<synchronous>, transform_indices = @transform_1, window_bounds = array<i64: 1, 128>}, {pipeline_mode = #tpu.pipeline_mode<synchronous>, transform_indices = @transform_2, window_bounds = array<i64: 1, 128>}, {transform_indices = @transform_3, window_bounds = array<i64: 128, 256>}, {transform_indices = @transform_4, window_bounds = array<i64: 8, 256>}, {pipeline_mode = #tpu.pipeline_mode<synchronous>, transform_indices = @transform_5, window_bounds = array<i64: 8, 128>}]} {
    %c0_i32 = arith.constant 0 : i32
    %0 = arith.cmpi eq, %arg0, %c0_i32 : i32
    %1 = arith.extui %0 : i1 to i32
    %c0_i32_0 = arith.constant 0 : i32
    %2 = arith.cmpi ne, %1, %c0_i32_0 : i32
    scf.if %2 {
      %c0_6 = arith.constant 0 : index
      %c0_7 = arith.constant 0 : index
      %7 = vector.load %arg1[%c0_6, %c0_7] : memref<8x128xf32, #tpu.memory_space<vmem>>, vector<8x128xf32>
      %8 = arith.mulf %7, %7 : vector<8x128xf32>
      %cst_8 = arith.constant dense<0.000000e+00> : vector<8xf32>
      %9 = vector.multi_reduction <add>, %8, %cst_8 [1] : vector<8x128xf32> to vector<8xf32>
      %10 = vector.shape_cast %9 : vector<8xf32> to vector<8x1xf32>
      %11 = math.sqrt %10 : vector<8x1xf32>
      %cst_9 = arith.constant 9.99999996E-13 : f32
      %12 = vector.broadcast %cst_9 : f32 to vector<8x1xf32>
      %13 = arith.maximumf %11, %12 : vector<8x1xf32>
      %14 = tpu.reciprocal %13 : vector<8x1xf32> -> vector<8x1xf32>
      %15 = vector.broadcast %14 : vector<8x1xf32> to vector<8x128xf32>
      %16 = arith.mulf %7, %15 : vector<8x128xf32>
      %c0_10 = arith.constant 0 : index
      %c0_11 = arith.constant 0 : index
      %17 = vector.load %arg6[%c0_10, %c0_11] : memref<8x128xf32, #tpu.memory_space<vmem>>, vector<8x128xf32>
      tpu.vector_store %arg6[%c0_10, %c0_11], %16 {strides = array<i32>} : memref<8x128xf32, #tpu.memory_space<vmem>>, vector<8x128xf32>,
      %cst_12 = arith.constant dense<0.000000e+00> : vector<128xf32>
      %18 = vector.multi_reduction <add>, %16, %cst_12 [0] : vector<8x128xf32> to vector<128xf32>
      %19 = vector.shape_cast %18 : vector<128xf32> to vector<1x128xf32>
      %cst_13 = arith.constant 8.000000e+00 : f32
      %20 = vector.broadcast %cst_13 : f32 to vector<1x128xf32>
      %21 = arith.divf %19, %20 : vector<1x128xf32>
      %22 = vector.broadcast %21 : vector<1x128xf32> to vector<8x128xf32>
      %23 = arith.subf %16, %22 : vector<8x128xf32>
      %24 = arith.mulf %23, %23 : vector<8x128xf32>
      %cst_14 = arith.constant dense<0.000000e+00> : vector<128xf32>
      %25 = vector.multi_reduction <add>, %24, %cst_14 [0] : vector<8x128xf32> to vector<128xf32>
      %26 = vector.shape_cast %25 : vector<128xf32> to vector<1x128xf32>
      %cst_15 = arith.constant 8.000000e+00 : f32
      %27 = vector.broadcast %cst_15 : f32 to vector<1x128xf32>
      %28 = arith.divf %26, %27 : vector<1x128xf32>
      %c0_16 = arith.constant 0 : index
      %c0_17 = arith.constant 0 : index
      %29 = vector.load %arg2[%c0_16, %c0_17] : memref<1x128xf32, #tpu.memory_space<vmem>>, vector<1x128xf32>
      %cst_18 = arith.constant 9.99999974E-6 : f32
      %30 = vector.broadcast %cst_18 : f32 to vector<1x128xf32>
      %31 = arith.addf %28, %30 : vector<1x128xf32>
      %32 = math.rsqrt %31 : vector<1x128xf32>
      %33 = arith.mulf %29, %32 : vector<1x128xf32>
      %34 = vector.broadcast %33 : vector<1x128xf32> to vector<8x128xf32>
      %35 = arith.mulf %23, %34 : vector<8x128xf32>
      %c0_19 = arith.constant 0 : index
      %c0_20 = arith.constant 0 : index
      %36 = vector.load %arg3[%c0_19, %c0_20] : memref<1x128xf32, #tpu.memory_space<vmem>>, vector<1x128xf32>
      %37 = vector.broadcast %36 : vector<1x128xf32> to vector<8x128xf32>
      %38 = arith.addf %35, %37 : vector<8x128xf32>
      %39 = arith.truncf %38 : vector<8x128xf32> to vector<8x128xbf16>
      %c0_21 = arith.constant 0 : index
      %c0_22 = arith.constant 0 : index
      %40 = vector.load %arg7[%c0_21, %c0_22] : memref<8x128xbf16, #tpu.memory_space<vmem>>, vector<8x128xbf16>
      tpu.vector_store %arg7[%c0_21, %c0_22], %39 {strides = array<i32>} : memref<8x128xbf16, #tpu.memory_space<vmem>>, vector<8x128xbf16>,
    } else {
    }
    %c0 = arith.constant 0 : index
    %c0_1 = arith.constant 0 : index
    %3 = vector.load %arg7[%c0, %c0_1] : memref<8x128xbf16, #tpu.memory_space<vmem>>, vector<8x128xbf16>
    %c0_2 = arith.constant 0 : index
    %c0_3 = arith.constant 0 : index
    %4 = vector.load %arg4[%c0_2, %c0_3] : memref<128x256xbf16, #tpu.memory_space<vmem>>, vector<128x256xbf16>
    %cst = arith.constant dense<0.000000e+00> : vector<8x256xf32>
    %5 = tpu.matmul %3, %4, %cst {dimension_numbers = #tpu.dot_dimension_numbers<[1], [0], [0], [1], [0, 0, 1, 1], [], []>} : vector<8x128xbf16>, vector<128x256xbf16>, vector<8x256xf32> -> vector<8x256xf32>
    %c0_4 = arith.constant 0 : index
    %c0_5 = arith.constant 0 : index
    %6 = vector.load %arg5[%c0_4, %c0_5] : memref<8x256xf32, #tpu.memory_space<vmem>>, vector<8x256xf32>
    tpu.vector_store %arg5[%c0_4, %c0_5], %5 {strides = array<i32>} : memref<8x256xf32, #tpu.memory_space<vmem>>, vector<8x256xf32>,
    return
  }
  func.func @transform_0(%arg0: i32) -> (i32, i32) {
    %c0_i32 = arith.constant 0 : i32
    %c0_i32_0 = arith.constant 0 : i32
    %c0_i32_1 = arith.constant 0 : i32
    return %c0_i32, %c0_i32_0 : i32, i32
  }
  func.func @transform_1(%arg0: i32) -> (i32, i32) {
    %c0_i32 = arith.constant 0 : i32
    %c0_i32_0 = arith.constant 0 : i32
    %c0_i32_1 = arith.constant 0 : i32
    return %c0_i32, %c0_i32_0 : i32, i32
  }
  func.func @transform_2(%arg0: i32) -> (i32, i32) {
    %c0_i32 = arith.constant 0 : i32
    %c0_i32_0 = arith.constant 0 : i32
    %c0_i32_1 = arith.constant 0 : i32
    return %c0_i32, %c0_i32_0 : i32, i32
  }
  func.func @transform_3(%arg0: i32) -> (i32, i32) {
    %c0_i32 = arith.constant 0 : i32
    %c0_i32_0 = arith.constant 0 : i32
    return %c0_i32, %arg0 : i32, i32
  }
  func.func @transform_4(%arg0: i32) -> (i32, i32) {
    %c0_i32 = arith.constant 0 : i32
    %c0_i32_0 = arith.constant 0 : i32
    return %c0_i32, %arg0 : i32, i32
  }
  func.func @transform_5(%arg0: i32) -> (i32, i32) {
    %c0_i32 = arith.constant 0 : i32
    %c0_i32_0 = arith.constant 0 : i32
    %c0_i32_1 = arith.constant 0 : i32
    return %c0_i32, %c0_i32_0 : i32, i32
  }
}

</mosaic_0001>

<bundles_post_ra>
// kernel: lbnneck_forward.1
= control target key start
LH: loop header
LB: loop body
LE: loop exit
PB: predicated region body
PF: predicated region fallthrough
CT: control target
= control target key end

     0   :  { %11 = vsyncpa [#allocation5], 0  ;;  %s786_s18 = smov 0   ;;  %s788_s19 = smov 0   ;;  %s901_s0 = inlined_call_operand.vmem [shape: f32[8,128], index: 0, kind: input, shape index: {}]   ;;  %s902_s1 = inlined_call_operand.vmem [shape: f32[1,128], index: 1, kind: input, shape index: {}]   ;;  %s903_s2 = inlined_call_operand.vmem [shape: f32[1,128], index: 2, kind: input, shape index: {}]   ;;  %s904_s3 = inlined_call_operand.vmem [shape: bf16[128,512], index: 3, kind: input, shape index: {}]   ;;  %s905_s4 = inlined_call_operand.vmem [shape: f32[8,512], index: 4, kind: output, shape index: {0}]   ;;  %s906_s5 = inlined_call_operand.hbm [shape: f32[8,128], index: 5, kind: output, shape index: {1}]  }
   0x1   :  { %s790_s20 = smov 0  }
   0x2 LB: > { %s802_s21 = sadd.s32 4294967295, %s752_s20   ;;  %s805_s22 = sadd.s32 1, %s752_s20   ;;  %s752_s20 = sphi %s790_s20, %s909_s20   ;;  %s748_s19 = sphi %s788_s19, %s908_s19   ;;  %s744_s18 = sphi %s786_s18, %s907_s18  }
   0x3   : > { %s84_s23 = ssub.s32 %s752_s20, %s805_s22  ;;  %s87_s24 = sadd.s32 1, %s748_s19 }
   0x4   : > { %p85_p0 = scmp.eq.s32.totalorder %s84_s23, 0  ;;  %p94_p1 = scmp.ne.s32.totalorder %s748_s19, %s744_s18 }
   0x5   : > { %p95_p2 = scmp.eq.s32.totalorder %s752_s20, 0  ;;  %p609_p4 = scmp.ge.s32.totalorder %s752_s20, 2 }
   0x6   : > { %s814_s25 = scalar_select %p85_p0, %s748_s19, %s87_s24  }
   0x7   : > { %p96_p3 = por %p95_p2, %p94_p1  ;;  %176 = sbr.rel (%p609_p4) target bundleno = 24 (0x18), region = 28 }
   0xc   : > { %179 = sbr.rel (!%p96_p3) target bundleno = 24 (0x18), region = 32  ;;  %s181_s26 = sand.u32 (%p96_p3), 1, %s748_s19  }
   0xd   : > { %s639_s27 = sshll.u32 (%p96_p3), %s752_s20, 3  ;;  %s610_s28 = sshll.u32 (%p96_p3), %s181_s26, 7 }
   0xe   : > { %s822_s6 = scalar_lea.vmem (%p96_p3), %s904_s3, %s639_s27  ;;  %s183_s7 = scalar_lea.vmem (%p96_p3), [#allocation3], %s610_s28 }
   0xf   : > { %v245_v0 = vld [vmem:[%s822_s6] sm:$0xff] (%p96_p3)  ;;  %v247_v1 = vld [vmem:[%s822_s6 + $0x10] sm:$0xff] (%p96_p3) }
  0x10   : > { %v249_v2 = vld [vmem:[%s822_s6 + $0x20] sm:$0xff] (%p96_p3)  ;;  %246 = vst [vmem:[%s183_s7] sm:$0xff] (%p96_p3), %v245_v0  ;;  %248 = vst [vmem:[%s183_s7 + $0x8] sm:$0xff] (%p96_p3), %v247_v1  ;;  %v251_v3 = vld [vmem:[%s822_s6 + $0x30] sm:$0xff] (%p96_p3) }
  0x11   : > { %250 = vst [vmem:[%s183_s7 + $0x10] sm:$0xff] %v249_v2  ;;  %v253_v4 = vld [vmem:[%s822_s6 + $0x40] sm:$0xff]  ;;  %v255_v5 = vld [vmem:[%s822_s6 + $0x50] sm:$0xff]  ;;  %252 = vst [vmem:[%s183_s7 + $0x18] sm:$0xff] %v251_v3 }
  0x12   : > { %254 = vst [vmem:[%s183_s7 + $0x20] sm:$0xff] %v253_v4  ;;  %256 = vst [vmem:[%s183_s7 + $0x28] sm:$0xff] %v255_v5  ;;  %v257_v6 = vld [vmem:[%s822_s6 + $0x60] sm:$0xff]  ;;  %v259_v7 = vld [vmem:[%s822_s6 + $0x70] sm:$0xff] }
  0x13   : > { %v261_v8 = vld [vmem:[%s822_s6 + $0x80] sm:$0xff]  ;;  %258 = vst [vmem:[%s183_s7 + $0x30] sm:$0xff] %v257_v6  ;;  %260 = vst [vmem:[%s183_s7 + $0x38] sm:$0xff] %v259_v7  ;;  %v263_v9 = vld [vmem:[%s822_s6 + $0x90] sm:$0xff] }
  0x14   : > { %262 = vst [vmem:[%s183_s7 + $0x40] sm:$0xff] %v261_v8  ;;  %v265_v10 = vld [vmem:[%s822_s6 + $0xa0] sm:$0xff]  ;;  %v267_v11 = vld [vmem:[%s822_s6 + $0xb0] sm:$0xff]  ;;  %264 = vst [vmem:[%s183_s7 + $0x48] sm:$0xff] %v263_v9 }
  0x15   : > { %266 = vst [vmem:[%s183_s7 + $0x50] sm:$0xff] %v265_v10  ;;  %268 = vst [vmem:[%s183_s7 + $0x58] sm:$0xff] %v267_v11  ;;  %v269_v12 = vld [vmem:[%s822_s6 + $0xc0] sm:$0xff]  ;;  %v271_v13 = vld [vmem:[%s822_s6 + $0xd0] sm:$0xff] }
  0x16   : > { %v273_v14 = vld [vmem:[%s822_s6 + $0xe0] sm:$0xff]  ;;  %270 = vst [vmem:[%s183_s7 + $0x60] sm:$0xff] %v269_v12  ;;  %272 = vst [vmem:[%s183_s7 + $0x68] sm:$0xff] %v271_v13  ;;  %v275_v15 = vld [vmem:[%s822_s6 + $0xf0] sm:$0xff] }
  0x17   : > { %274 = vst [vmem:[%s183_s7 + $0x70] sm:$0xff] %v273_v14  ;;  %276 = vst [vmem:[%s183_s7 + $0x78] sm:$0xff] %v275_v15 }
  0x18 PF: > { %p613_p5 = scmp.ge.s32.totalorder %s752_s20, 1  ;;  %p281_p6 = scmp.lt.s32.totalorder %s752_s20, 3 }
  0x1a   : > { %p282_p7 = pnand %p613_p5, %p281_p6 }
  0x1b   : > { %s288_s8 = sand.u32 (!%p282_p7), 1, %s744_s18   ;;  %s615_s9 = sshll.u32 (!%p282_p7), %s802_s21, 1 }
  0x1c   : > { %285 = sbr.rel (%p282_p7) target bundleno = 508 (0x1fc), region = 70  ;;  %s614_s10 = sshll.u32 (!%p282_p7), %s288_s8, 7 }
  0x1d   : > { %p317_p8 = scmp.lt.s32.totalorder (!%p282_p7), %s615_s9, 3  ;;  %s849_s15 = scalar_lea.vmem (!%p282_p7), [#allocation3], %s614_s10 }
  0x1e   : > { %p617_p9 = scmp.ne.s32.totalorder (!%p282_p7), %s802_s21, 0 }
  0x21   : > { %s911_s9 = smov (!%p317_p8, %s615_s9), 3  ;;  %326 = sbr.rel (%p617_p9) target bundleno = 274 (0x112), region = 78 }
  0x22   : > { %s616_s11 = sshll.u32 %s911_s9, 3 }
  0x23   : > { %s847_s14 = scalar_lea.vmem %s905_s4, %s616_s11 }
  0x26   : > { %v327_v16 = vld [vmem:[%s901_s0] sm:$0xff]  ;;  %v364_v44 = vlaneseq }
  0x27   : > { %v328_v17 = vmul.f32 %v327_v16, %v327_v16  ;;  %v359_v46 = vld [vmem:[%s902_s1] sm:$0x1] }
  0x28   : > { %v365_v45 = vshrl.u32 %v364_v44, 7  ;;  %v618_v51 = vld [vmem:[%s903_s2] ss:$0 sm:$0xff] }
  0x29   : > { %329 = vadd.xlane.f32.xlu0 %v328_v17 }
  0x2a   : > { %v366_v47 = vsub.s32 0, %v365_v45 }
  0xb2   : > { %v330_v18 = vpop.xlane.xlu0 %329 }
  0xb3   : > { %672 = vrsqrt.f32 %v330_v18  ;;  %vm333_vm0 = vcmp.eq.f32.partialorder %v330_v18, inf  ;;  %v336_v21 = vand.u32 2147483648, %v330_v18  ;;  %vm335_vm1 = vcmp.eq.f32.partialorder %v330_v18, 0.0 }
  0xc0   : > { %v673_v19 = vpop.eup %672 }
  0xc1   : > { %v332_v20 = vmul.f32 %v673_v19, %v330_v18 }
  0xc3   : > { %v334_v22 = vsel %vm333_vm0, %v330_v18, %v332_v20 }
  0xc4   : > { %v337_v23 = vsel %vm335_vm1, %v336_v21, %v334_v22 }
  0xc5   : > { %v338_v24 = vmax.f32 %v337_v23, 1e-12 }
  0xc7   : > { %674 = vrcp.f32 %v338_v24 }
  0xd4   : > { %v675_v25 = vpop.eup %674 }
  0xd5   : > { %v340_v26 = vmul.f32 %v675_v25, %v327_v16 }
  0xd7   : > { %341 = vst [vmem:[#allocation4] sm:$0xff] %v340_v26  ;;  %v342_v27 = vrot.slane %v340_v26, 4 }
  0xd9   : > { %v343_v28 = vadd.f32 %v342_v27, %v340_v26 }
  0xdb   : > { %v344_v29 = vrot.slane %v343_v28, 2 }
  0xdd   : > { %v345_v30 = vadd.f32 %v344_v29, %v343_v28 }
  0xdf   : > { %v346_v31 = vrot.slane %v345_v30, 1 }
  0xe1   : > { %v347_v32 = vadd.f32 %v346_v31, %v345_v30 }
  0xe3   : > { %v349_v33 = vmul.f32 0.125, %v347_v32 }
  0xe5   : > { %v350_v34 = vsub.f32 %v340_v26, %v349_v33 }
  0xe7   : > { %v351_v35 = vmul.f32 %v350_v34, %v350_v34 }
  0xe9   : > { %v352_v36 = vrot.slane %v351_v35, 4 }
  0xeb   : > { %v353_v37 = vadd.f32 %v352_v36, %v351_v35 }
  0xed   : > { %v354_v38 = vrot.slane %v353_v37, 2 }
  0xef   : > { %v355_v39 = vadd.f32 %v354_v38, %v353_v37 }
  0xf1   : > { %v356_v40 = vrot.slane %v355_v39, 1 }
  0xf3   : > { %v357_v41 = vadd.f32 %v356_v40, %v355_v39 }
  0xf5   : > { %v358_v42 = vmul.f32 0.125, %v357_v41 }
  0xf7   : > { %v360_v43 = vadd.f32 1e-05, %v358_v42 }
  0xf9   : > { %676 = vrsqrt.f32 %v360_v43 }
 0x106   : > { %v677_v48 = vpop.eup %676 }
 0x107   : > { %v362_v49 = vmul.f32 %v677_v48, %v359_v46 }
 0x109   : > { %v367_v50 = vrot.slane %v362_v49, %v366_v47 }
 0x10b   : > { %v369_v52 = vmul.f32 %v367_v50, %v350_v34 }
 0x10d   : > { %v377_v53 = vadd.f32 %v618_v51, %v369_v52 }
 0x10f   : > { %v378_v54 = vpack.c.bf16 %v377_v53, %v377_v53 }
 0x111   : > { %379 = vst [vmem:[#allocation2] sm:$0xf] %v378_v54 }
 0x112 PF: > { %v678_v55 = vld [vmem:[%s849_s15 + $0x74] ss:$8 sps:$4 sm:$0xff]   ;;  %v680_v56 = vld [vmem:[%s849_s15 + $0x70] ss:$8 sps:$4 sm:$0xff]   ;;  %v754_v57 = vmov 0   ;;  %p644_p10 = scmp.eq.s32.totalorder %s802_s21, 1 }
 0x113   : > { %509 = vmatprep.mubr.bf16.mxu0 %v754_v57  ;;  %477 = vmatprep.subr.bf16.mxu0 %v678_v55  ;;  %v681_v58 = vld [vmem:[%s849_s15 + $0x64] ss:$8 sps:$4 sm:$0xff]   ;;  %v683_v59 = vld [vmem:[%s849_s15 + $0x60] ss:$8 sps:$4 sm:$0xff]   ;;  %v684_v60 = vld [vmem:[%s849_s15 + $0x54] ss:$8 sps:$4 sm:$0xff]  }
 0x114   : > { %478 = vmatpush1.bf16.msra.mxu0 %v680_v56  ;;  %v686_v61 = vld [vmem:[%s849_s15 + $0x50] ss:$8 sps:$4 sm:$0xff]   ;;  %v687_v62 = vld [vmem:[%s849_s15 + $0x44] ss:$8 sps:$4 sm:$0xff]   ;;  %v689_v63 = vld [vmem:[%s849_s15 + $0x40] ss:$8 sps:$4 sm:$0xff]  }
 0x115   : > { %479 = vmatprep.subr.bf16.mxu0 %v681_v58  ;;  %v690_v0 = vld [vmem:[%s849_s15 + $0x34] ss:$8 sps:$4 sm:$0xff]   ;;  %v692_v1 = vld [vmem:[%s849_s15 + $0x30] ss:$8 sps:$4 sm:$0xff]   ;;  %v693_v2 = vld [vmem:[%s849_s15 + $0x24] ss:$8 sps:$4 sm:$0xff]  }
 0x116   : > { %v695_v3 = vld [vmem:[%s849_s15 + $0x20] ss:$8 sps:$4 sm:$0xff]   ;;  %v696_v4 = vld [vmem:[%s849_s15 + $0x14] ss:$8 sps:$4 sm:$0xff]   ;;  %v698_v5 = vld [vmem:[%s849_s15 + $0x10] ss:$8 sps:$4 sm:$0xff]  }
 0x117   : > { %v699_v6 = vld [vmem:[%s849_s15 + $0x4] ss:$8 sps:$4 sm:$0xff]   ;;  %v701_v7 = vld [vmem:[%s849_s15] ss:$8 sps:$4 sm:$0xff]   ;;  %s755_s26 = smov [#allocation4]  }
 0x118   : > { %480 = vmatpush1.bf16.msra.mxu0 %v683_v59  ;;  %v380_v8 = vld [vmem:[#allocation2] sm:$0xf]  ;;  %s536_s27 = sshll.u32 %s755_s26, 4  ;;  %s537_s27 = int_to_ptr.vmem [resolvable:$true] %s536_s27 }
 0x119   : > { %481 = vmatprep.subr.bf16.mxu0 %v684_v60  ;;  %s702_s28 = scalar_lea.vmem %s537_s27, 128  ;;  %p709_p0 = scmp.lt.s32.totalorder %s537_s27, %s537_s27 }
 0x11a   : > { %p703_p11 = scmp.ne.s32.totalorder %s537_s27, %s702_s28  ;;  %p710_p1 = scmp.lt.s32.totalorder %s702_s28, %s702_s28 }
 0x11c   : > { %482 = vmatpush1.bf16.msra.mxu0 %v686_v61  ;;  %p704_p12 = pnand %p703_p11, %p644_p10  ;;  %p711_p2 = por %p710_p1, %p709_p0 }
 0x11d   : > { %483 = vmatprep.subr.bf16.mxu0 %v687_v62 }
 0x11e   : > { %p705_p13 = pneg %p704_p12 }
 0x120   : > { %484 = vmatpush1.bf16.msra.mxu0 %v689_v63  ;;  %p712_p3 = pnand %p711_p2, %p705_p13 }
 0x121   : > { %485 = vmatprep.subr.bf16.mxu0 %v690_v0 }
 0x124   : > { %486 = vmatpush1.bf16.msra.mxu0 %v692_v1 }
 0x125   : > { %487 = vmatprep.subr.bf16.mxu0 %v693_v2 }
 0x128   : > { %488 = vmatpush1.bf16.msra.mxu0 %v695_v3 }
 0x129   : > { %489 = vmatprep.subr.bf16.mxu0 %v696_v4 }
 0x12c   : > { %490 = vmatpush1.bf16.msra.mxu0 %v698_v5 }
 0x12d   : > { %491 = vmatprep.subr.bf16.mxu0 %v699_v6 }
 0x130   : > { %492 = vmatpush1.bf16.msra.mxu0 %v701_v7 }
 0x133   : > { %510 = vmatmul.mubr.bf16.vlgmr.msra.gmra.mxu0 %v380_v8 }
 0x134   : > { %715 = shalt.err (!%p712_p3)
}
 0x135   : > { %641 = dma.vmem_to_hbm [thread:$0]  (%p644_p10), %s537_s27, 128, %s906_s5, [#allocation5]  }
 0x1f3   : > { %v511_v9 = vpop.f32.mrf.mxu0 }
 0x1f4   : > { %518 = vst [vmem:[%s847_s14] sm:$0xff] %v511_v9 }
 0x1f5   : > { %v513_v10 = vpop.f32.mrf.mxu0 }
 0x1f6   : > { %519 = vst [vmem:[%s847_s14 + $0x8] sm:$0xff] %v513_v10 }
 0x1f7   : > { %v515_v11 = vpop.f32.mrf.mxu0 }
 0x1f9   : > { %v516_v12 = vpop.f32.mrf.mxu0 }
 0x1fa   : > { %739 = dma.done.wait (%p644_p10), [#allocation5], 128  }
 0x1fb   : > { %741 = vsyncadd (%p644_p10), [#allocation5], 4294967168 }
 0x1fc PF: > { %p14_p4 = scmp.ge.s32.totalorder %s805_s22, 4   ;;  %s907_s18 = smov %s748_s19 }
 0x1fd   : > { %s908_s19 = smov %s814_s25  ;;  %s909_s20 = smov %s805_s22 }
 0x1fe   :  { %16 = sbr.rel (!%p14_p4) target bundleno = 2 (0x2), region = 122 }
 0x203   :  { %557 = vsyncpa [#allocation5], 1 }
 0x204   :  { %559 = vsyncpa [#allocation5 + $0x1], 1 }

</bundles_post_ra>
